<compile_context>
chip_gen: v7x
topology: tpu7x:2x2x1
jax: 0.10.0
libtpu: 0.0.40
codegen_flags: <defaults>
</compile_context>

<pallas_src>
import functools

import jax
import jax.numpy as jnp
from jax import lax
from jax.experimental import pallas as pl
from jax.experimental.pallas import tpu as pltpu


def _cdiv(a, b):
    return -(-a // b)


def _round_up(a, m):
    return _cdiv(a, m) * m


# Below this many input bytes, a Pallas launch (us-scale fixed fill/drain cost)
# loses to a fused XLA matmul.
_FAST_PATH_BYTES = 4 << 20


def _vmem_capacity_bytes():
    """Physical VMEM per TensorCore (trace-time query, conservative fallback)."""
    try:
        return int(pltpu.get_tpu_info().vmem_capacity_bytes)
    except Exception:
        return 64 << 20   # v7x per-TC size == the smallest across v5e/v6e/v7x


def _num_tensorcores():
    """TensorCores per chip: 2 on v7x, 1 on v5e/v6e."""
    try:
        kind = jax.devices()[0].device_kind.lower()
    except Exception:
        return 1
    return 2 if ("v7" in kind or "7x" in kind) else 1


def _padded_rows(b, itemsize):
    # Physical sublane tile height is 32//itemsize rows (8 f32, 16 bf16,
    # 32 int8); a (B, tk) VMEM buffer is padded up to that many rows.
    return _round_up(b, max(8, 32 // max(1, itemsize)))


def _gram_kernel(x_ref, out_ref, *, d, tk, cps, n_chunks, mxu_bf16):
    """Accumulate a partial Gram (x @ x.T) over one (B, tk) chunk of D.

    Grid = (n_split, cps).  Axis 0 selects which output partial this core
    accumulates into (core-parallel on v7x); axis 1 streams the chunks of D
    assigned to that split.  Tail / empty chunk slots are masked / skipped.
    """
    c = pl.program_id(0)
    k = pl.program_id(1)
    chunk = c * cps + k            # logical chunk index along D

    @pl.when(k == 0)
    def _():
        out_ref[...] = jnp.zeros_like(out_ref)

    # Contract the feature axis of BOTH operands: x @ x.T with the transposed
    # operand loaded natively by the MXU (no materialized (B,tk)->(tk,B)
    # transpose through the XLU).
    dims = (((1,), (1,)), ((), ()))

    def accumulate(x):
        if mxu_bf16:
            x = x.astype(jnp.bfloat16)
        out_ref[0] += lax.dot_general(x, x, dims,
                                      preferred_element_type=jnp.float32)

    if d % tk == 0:
        # Every real chunk is full-width; just skip empty split slots.
        @pl.when(chunk < n_chunks)
        def _():
            accumulate(x_ref[...])
    else:
        @pl.when(chunk < n_chunks - 1)
        def _():
            accumulate(x_ref[...])

        # Tail chunk: out-of-bounds lanes are undefined -> mask them to zero.
        @pl.when(chunk == n_chunks - 1)
        def _():
            x = x_ref[...]
            col = lax.broadcasted_iota(jnp.int32, x.shape, 1)
            accumulate(jnp.where(col < d - chunk * tk, x, jnp.zeros_like(x)))


def _gram_partials(x, *, tk=None, n_split=None, mxu_bf16=False):
    """Streaming x @ x.T (reduction over the feature dim) as a Pallas kernel.

    x: (B, D), any float dtype (fed natively to the MXU, f32 accumulation).
    Returns (n_split, B, B) f32 partial Grams; their sum over axis 0 is the
    full Gram.
    """
    b, d = x.shape
    itemsize = jnp.dtype(x.dtype).itemsize
    rows = _padded_rows(b, itemsize)        # physical sublane-padded rows

    capacity = _vmem_capacity_bytes()
    vmem_limit = (capacity * 3) // 4        # explicit scoped-VMEM limit
    # Keep the PADDED double-buffered input pipeline <= half the limit; the
    # (1, B, B) f32 output blocks + compiler scratch fit in the remainder.
    per_buffer_budget = vmem_limit // 4

    if tk is None:
        max_tk = max(128, ((per_buffer_budget // (rows * itemsize)) // 128) * 128)
        tk = d if d <= max_tk else max_tk
    else:
        tk = min(tk, d)
        if tk < d:
            tk = max(128, (tk // 128) * 128)   # lane-aligned tiles required

    n_chunks = _cdiv(d, tk)
    n_cores = _num_tensorcores()
    if n_split is None:
        n_split = n_cores                      # 1 on v5e/v6e, 2 on v7x
    n_split = max(1, min(n_split, n_chunks))
    cps = _cdiv(n_chunks, n_split)             # chunk slots per split

    kernel = functools.partial(_gram_kernel, d=d, tk=tk, cps=cps,
                               n_chunks=n_chunks, mxu_bf16=mxu_bf16)

    def x_index(c, k):
        # Clamp so empty trailing slots re-read the last valid block (their
        # compute is skipped in-kernel); avoids a fully out-of-bounds DMA.
        return (0, jnp.minimum(c * cps + k, n_chunks - 1))

    def call(dim_sem):
        return pl.pallas_call(
            kernel,
            out_shape=jax.ShapeDtypeStruct((n_split, b, b), jnp.float32),
            grid_spec=pltpu.PrefetchScalarGridSpec(
                num_scalar_prefetch=0,
                grid=(n_split, cps),
                in_specs=[pl.BlockSpec((b, tk), x_index)],
                out_specs=pl.BlockSpec((1, b, b), lambda c, k: (c, 0, 0)),
            ),
            compiler_params=pltpu.CompilerParams(
                dimension_semantics=dim_sem,
                vmem_limit_bytes=int(vmem_limit)),
        )(x)

    # v7x: CORE_PARALLEL actually core-shards the split axis across both TCs
    # (plain "parallel" does not change codegen); fall back gracefully if the
    # runtime rejects it.  Single-TC chips just use a serial size-1 axis.
    if n_split > 1 and n_cores > 1:
        candidates = [(pltpu.CORE_PARALLEL, pltpu.ARBITRARY),
                      ("parallel", "arbitrary")]
    elif n_split > 1:
        candidates = [("parallel", "arbitrary")]
    else:
        candidates = [("arbitrary", "arbitrary")]

    for sem in candidates[:-1]:
        try:
            return call(sem)
        except Exception:
            pass
    return call(candidates[-1])


def _gram(x, *, tk=None, n_split=None, mxu_bf16=False, force_pallas=False):
    """x @ x.T with f32 accumulation; small inputs skip the Pallas launch."""
    b, d = x.shape
    if (not force_pallas
            and b * d * jnp.dtype(x.dtype).itemsize <= _FAST_PATH_BYTES):
        # Same contraction as the kernel (no transpose, f32 accumulate); XLA
        # fuses this with the epilogue and beats a kernel launch at this size.
        return lax.dot_general(x, x, (((1,), (1,)), ((), ())),
                               preferred_element_type=jnp.float32)
    return _gram_partials(x, tk=tk, n_split=n_split,
                          mxu_bf16=mxu_bf16).sum(axis=0)


def sp_similarity(f_s, f_t, *, tk=None, n_split=None, mxu_bf16=False,
                  force_pallas=False):
    """SP similarity for one (student, teacher) feature pair. Returns (1,)."""
    bsz = f_s.shape[0]
    assert f_t.shape[0] == bsz
    fs = f_s.reshape(bsz, -1)    # row-major flatten == torch .view(bsz, -1)
    ft = f_t.reshape(bsz, -1)

    kw = dict(tk=tk, n_split=n_split, mxu_bf16=mxu_bf16,
              force_pallas=force_pallas)
    g_s = _gram(fs, **kw)
    g_t = _gram(ft, **kw)

    def norm_rows(g):
        # torch.nn.functional.normalize(p=2, dim=1, eps=1e-12)
        n = jnp.sqrt(jnp.sum(g * g, axis=1, keepdims=True))
        return g / jnp.maximum(n, 1e-12)

    g_diff = norm_rows(g_t) - norm_rows(g_s)
    loss = jnp.sum(g_diff * g_diff) / (bsz * bsz)
    return loss.reshape(1)


def sp_loss(s_features, t_features, **kwargs):
    """forward(): sum of per-pair SP similarities. Returns shape (1,)."""
    total = jnp.zeros((1,), jnp.float32)
    for f_s, f_t in zip(s_features, t_features):
        total = total + sp_similarity(f_s, f_t, **kwargs)
    return total


def _sp_loss_ref(s_features, t_features):
    """Pure-JAX reference mirroring the PyTorch module."""
    def sim(f_s, f_t):
        bsz = f_s.shape[0]
        fs = f_s.reshape(bsz, -1).astype(jnp.float32)
        ft = f_t.reshape(bsz, -1).astype(jnp.float32)

        def norm_rows(g):
            n = jnp.sqrt(jnp.sum(g * g, axis=1, keepdims=True))
            return g / jnp.maximum(n, 1e-12)

        gs = norm_rows(fs @ fs.T)
        gt = norm_rows(ft @ ft.T)
        d = gt - gs
        return jnp.sum(d * d) / (bsz * bsz)

    return sum(sim(a, b) for a, b in zip(s_features, t_features))


if __name__ == "__main__":
    key = jax.random.PRNGKey(0)
    k1, k2, k3, k4, k5, k6, k7 = jax.random.split(key, 7)

    # Two (student, teacher) feature pairs, NCHW, batch=2.
    s_features = [
        jax.random.normal(k1, (2, 4, 16, 16), jnp.float32),
        jax.random.normal(k2, (2, 8, 8, 8), jnp.float32),
    ]
    t_features = [
        jax.random.normal(k3, (2, 4, 16, 16), jnp.float32),
        jax.random.normal(k4, (2, 8, 8, 8), jnp.float32),
    ]

    # Full module forward (these small shapes take the fused-XLA fast path).
    out = jax.block_until_ready(sp_loss(s_features, t_features))
    ref = jax.block_until_ready(_sp_loss_ref(s_features, t_features))
    assert out.shape == (1,)
    assert jnp.allclose(out[0], ref, rtol=1e-4, atol=1e-5), (out, ref)

    # Same pair forced through the Pallas streaming-Gram path (auto-sized tk,
    # single full-width chunk, split axis clamped to 1).
    out_p = jax.block_until_ready(
        sp_similarity(s_features[0], t_features[0], force_pallas=True))
    ref_p = jax.block_until_ready(_sp_loss_ref([s_features[0]], [t_features[0]]))
    assert jnp.allclose(out_p[0], ref_p, rtol=1e-4, atol=1e-5), (out_p, ref_p)

    # Stress the multi-chunk / tail-mask / empty-split-slot paths with a forced
    # small reduction tile (D=600 -> 5 chunks of 128, partial tail, uneven
    # split across TensorCores on multi-core chips).
    x_odd = jax.random.normal(k5, (2, 600), jnp.float32)
    g = jax.block_until_ready(_gram_partials(x_odd, tk=128).sum(axis=0))
    assert jnp.allclose(g, x_odd @ x_odd.T, rtol=1e-4, atol=1e-2), g

    # Optional in-kernel bf16 MXU path (v5e large-B option): loose tolerance.
    g_bf = jax.block_until_ready(
        _gram_partials(x_odd, tk=128, mxu_bf16=True).sum(axis=0))
    assert jnp.allclose(g_bf, x_odd @ x_odd.T, rtol=5e-2, atol=1.0), g_bf

    # Full similarity on a non-128-divisible feature map through Pallas.
    s3 = jax.random.normal(k6, (2, 3, 15, 15), jnp.float32)
    t3 = jax.random.normal(k7, (2, 3, 15, 15), jnp.float32)
    out3 = jax.block_until_ready(
        sp_similarity(s3, t3, tk=128, force_pallas=True))
    ref3 = jax.block_until_ready(_sp_loss_ref([s3], [t3]))
    assert jnp.allclose(out3[0], ref3, rtol=1e-4, atol=1e-5), (out3, ref3)

    print("KERNEL_OK")
</pallas_src>

<mosaic_0001>
module attributes {stable_mosaic.version = 11 : i64} {
  func.func @_gram_kernel(%arg0: i32, %arg1: i32, %arg2: memref<2x1024xf32, #tpu.memory_space<vmem>>, %arg3: memref<1x2x2xf32, #tpu.memory_space<vmem>>) attributes {dimension_semantics = [#tpu.dimension_semantics<arbitrary>, #tpu.dimension_semantics<arbitrary>], iteration_bounds = array<i64: 1, 1>, scalar_prefetch = 0 : i64, scratch_operands = 0 : i64, tpu.core_type = #tpu.core_type<tc>, window_params = [{transform_indices = @transform_0, window_bounds = array<i64: 2, 1024>}, {transform_indices = @transform_1, window_bounds = array<i64: 1, 2, 2>}]} {
    %c1_i32 = arith.constant 1 : i32
    %0 = arith.muli %arg0, %c1_i32 : i32
    %1 = arith.addi %0, %arg1 : i32
    %c0_i32 = arith.constant 0 : i32
    %2 = arith.cmpi eq, %arg1, %c0_i32 : i32
    %3 = arith.extui %2 : i1 to i32
    %c0_i32_0 = arith.constant 0 : i32
    %4 = arith.cmpi ne, %3, %c0_i32_0 : i32
    scf.if %4 {
      %cst = arith.constant 0.000000e+00 : f32
      %8 = vector.broadcast %cst : f32 to vector<1x2x2xf32>
      %c0 = arith.constant 0 : index
      %c0_3 = arith.constant 0 : index
      %c0_4 = arith.constant 0 : index
      %9 = vector.load %arg3[%c0, %c0_3, %c0_4] : memref<1x2x2xf32, #tpu.memory_space<vmem>>, vector<1x2x2xf32>
      tpu.vector_store %arg3[%c0, %c0_3, %c0_4], %8 {strides = array<i32>} : memref<1x2x2xf32, #tpu.memory_space<vmem>>, vector<1x2x2xf32>,
    } else {
    }
    %c1_i32_1 = arith.constant 1 : i32
    %5 = arith.cmpi slt, %1, %c1_i32_1 : i32
    %6 = arith.extui %5 : i1 to i32
    %c0_i32_2 = arith.constant 0 : i32
    %7 = arith.cmpi ne, %6, %c0_i32_2 : i32
    scf.if %7 {
      %c0 = arith.constant 0 : index
      %c0_3 = arith.constant 0 : index
      %8 = vector.load %arg2[%c0, %c0_3] : memref<2x1024xf32, #tpu.memory_space<vmem>>, vector<2x1024xf32>
      %c0_4 = arith.constant 0 : index
      %c0_5 = arith.constant 0 : index
      %c0_6 = arith.constant 0 : index
      %9 = vector.load %arg3[%c0_4, %c0_5, %c0_6] : memref<1x2x2xf32, #tpu.memory_space<vmem>>, vector<1x2x2xf32>
      %10 = vector.shape_cast %9 : vector<1x2x2xf32> to vector<2x2xf32>
      %cst = arith.constant dense<0.000000e+00> : vector<2x2xf32>
      %11 = tpu.matmul %8, %8, %cst {dimension_numbers = #tpu.dot_dimension_numbers<[1], [1], [0], [0], [0, 0, 1, 0], [], []>} : vector<2x1024xf32>, vector<2x1024xf32>, vector<2x2xf32> -> vector<2x2xf32>
      %12 = arith.addf %10, %11 : vector<2x2xf32>
      %c0_7 = arith.constant 0 : index
      %c0_8 = arith.constant 0 : index
      %c0_9 = arith.constant 0 : index
      %13 = vector.load %arg3[%c0_7, %c0_8, %c0_9] : memref<1x2x2xf32, #tpu.memory_space<vmem>>, vector<1x2x2xf32>
      %14 = vector.shape_cast %13 : vector<1x2x2xf32> to vector<2x2xf32>
      %15 = vector.shape_cast %12 : vector<2x2xf32> to vector<1x2x2xf32>
      tpu.vector_store %arg3[%c0_7, %c0_8, %c0_9], %15 {strides = array<i32>} : memref<1x2x2xf32, #tpu.memory_space<vmem>>, vector<1x2x2xf32>,
    } else {
    }
    return
  }
  func.func @transform_0(%arg0: i32, %arg1: i32) -> (i32, i32) {
    %c1_i32 = arith.constant 1 : i32
    %0 = arith.muli %arg0, %c1_i32 : i32
    %1 = arith.addi %0, %arg1 : i32
    %c0_i32 = arith.constant 0 : i32
    %2 = arith.minsi %1, %c0_i32 : i32
    %c0_i32_0 = arith.constant 0 : i32
    %c0_i32_1 = arith.constant 0 : i32
    return %c0_i32_0, %2 : i32, i32
  }
  func.func @transform_1(%arg0: i32, %arg1: i32) -> (i32, i32, i32) {
    %c0_i32 = arith.constant 0 : i32
    %c0_i32_0 = arith.constant 0 : i32
    %c0_i32_1 = arith.constant 0 : i32
    return %arg0, %c0_i32, %c0_i32_0 : i32, i32, i32
  }
}

</mosaic_0001>

<bundles_post_ra>
// kernel: tpu_custom_call.1
= control target key start
LH: loop header
LB: loop body
LE: loop exit
PB: predicated region body
PF: predicated region fallthrough
CT: control target
= control target key end

     0   :  { %6 = vsyncpa [#allocation3], 0  ;;  %s483_s0 = inlined_call_operand.hbm [shape: f32[2,1024], index: 0, kind: input, shape index: {}]   ;;  %s484_s1 = inlined_call_operand.hbm [shape: f32[1,2,2], index: 1, kind: output, shape index: {}]  }
   0x1   :  { %7 = vsyncpa [#allocation4], 0  ;;  %s443_s6 = smov [#allocation2]   ;;  %s395_s10 = scalar_lea.hbm %s483_s0, 256 }
   0x2   :  { %s20_s7 = sshll.u32 %s443_s6, 4  ;;  %p396_p0 = scmp.ne.s32.totalorder %s483_s0, %s395_s10  ;;  %s21_s7 = int_to_ptr.vmem [resolvable:$true] %s20_s7 }
   0x3   :  { %p399_p1 = scmp.lt.u32.totalorder %s395_s10, %s483_s0 }
   0x5   :  { %p401_p2 = pnand %p399_p1, %p396_p0 }
   0x7   :  { %404 = shalt.err (!%p401_p2)
}
   0x8   :  { %s405_s15 = scalar_lea.vmem %s21_s7, 256  ;;  %p410_p4 = scmp.lt.s32.totalorder %s21_s7, %s21_s7 }
   0x9   :  { %p406_p3 = scmp.ne.s32.totalorder %s21_s7, %s405_s15  ;;  %p411_p5 = scmp.lt.s32.totalorder %s405_s15, %s405_s15 }
   0xb   :  { %p412_p6 = por %p411_p5, %p410_p4 }
   0xd   :  { %p413_p7 = pnand %p412_p6, %p406_p3 }
   0xf   :  { %416 = shalt.err (!%p413_p7)
}
  0x10   :  { %23 = dma.hbm_to_vmem [thread:$0]  %s483_s0, 256, %s21_s7, [#allocation3]  }
  0x11   :  { %439 = dma.done.wait [#allocation3], 256  }
  0x12   :  { %440 = vsyncadd [#allocation3], 4294967040  ;;  %vm36_vm0 = vcmask 9216   ;;  %v51_v0 = vlaneseq  ;;  %v444_v1 = vmov 0.0   ;;  %v445_v2 = vmov 1983009808  }
  0x13   :  { %37 = vst.msk [vmem:[#allocation5] sm:$0x3] %vm36_vm0, %v444_v1  ;;  %v49_v3 = vunpack.c.l.s4 %v445_v2  ;;  %v42_v7 = vld [vmem:[#allocation2] sm:$0xff]  ;;  %v43_v8 = vld [vmem:[#allocation2 + $0x8] sm:$0xff]  ;;  %s446_s0 = smov [#allocation5]  }
  0x14   :  { %v52_v4 = vshrl.u32 %v51_v0, 7  ;;  %v47_v10 = vcombine.high %v42_v7, %v42_v7  ;;  %v64_v12 = vcombine.high %v43_v8, %v43_v8  ;;  %s378_s18 = sshll.u32 %s446_s0, 4  ;;  %s379_s18 = int_to_ptr.vmem [resolvable:$true] %s378_s18 }
  0x15   :  { %v50_v5 = vunpack.c.0.s8 %v49_v3  ;;  %s417_s19 = scalar_lea.vmem %s379_s18, 32  ;;  %p422_p9 = scmp.lt.s32.totalorder %s379_s18, %s379_s18 }
  0x16   :  { %p418_p8 = scmp.ne.s32.totalorder %s379_s18, %s417_s19  ;;  %p423_p10 = scmp.lt.s32.totalorder %s417_s19, %s417_s19 }
  0x17   :  { %v53_v6 = vsub.s32 %v50_v5, %v52_v4 }
  0x18   :  { %p424_p11 = por %p423_p10, %p422_p9 }
  0x19   :  { %v54_v9 = vrot.slane %v42_v7, %v53_v6  ;;  %v71_v11 = vrot.slane %v43_v8, %v53_v6  ;;  %v61_v14 = vrot.slane %v47_v10, %v53_v6  ;;  %v78_v16 = vrot.slane %v64_v12, %v53_v6 }
  0x1a   :  { %v44_v27 = vld [vmem:[#allocation5] sm:$0x3]  ;;  %p425_p12 = pnand %p424_p11, %p418_p8 }
  0x1b   :  { %v62_v13 = vcombine.high %v54_v9, %v54_v9  ;;  %v79_v15 = vcombine.high %v71_v11, %v71_v11  ;;  %v63_v17 = vcombine.high %v61_v14, %v61_v14  ;;  %v80_v18 = vcombine.high %v78_v16, %v78_v16 }
  0x1d   :  { %89 = vmatprep.subr.mxu0 %v62_v13  ;;  %153 = vmatprep.mubr.f32.mxu0 %v62_v13 }
  0x1e   :  { %90 = vmatpush1.xpose.msra.mxu0 %v54_v9  ;;  %159 = vmatprep.subr.mxu1 %v63_v17 }
  0x1f   :  { %229 = vmatprep.subr.mxu0 %v79_v15  ;;  %160 = vmatpush1.xpose.msra.mxu1 %v61_v14 }
  0x20   :  { %223 = vmatprep.mubr.f32.mxu1 %v63_v17  ;;  %299 = vmatprep.subr.mxu1 %v80_v18 }
  0x21   :  { %154 = vmatmul.mubr.f32.vlgmr.msra.gmra.mrb[0].mxu0 %v54_v9 }
  0x22   :  { %230 = vmatpush1.xpose.msra.mxu0 %v71_v11  ;;  %293 = vmatprep.mubr.f32.mxu0 %v79_v15 }
  0x23   :  { %224 = vmatmul.mubr.f32.vlgmr.msra.gmra.mrb[0].mxu1 %v61_v14 }
  0x24   :  { %300 = vmatpush1.xpose.msra.mxu1 %v78_v16  ;;  %363 = vmatprep.mubr.f32.mxu1 %v80_v18 }
  0x25   :  { %294 = vmatmul.mubr.f32.vlgmr.msra.gmra.mrb[2].mxu0 %v71_v11 }
  0x27   :  { %364 = vmatmul.mubr.f32.vlgmr.msra.gmra.mrb[2].mxu1 %v78_v16 }
  0xf4   :  { %v155_v19 = vpop.f32.mrb[0].mxu0 }
  0xf5   :  { %v157_v20 = vpop.f32.mrb[1].mxu0 }
  0xf6   :  { %v225_v21 = vpop.f32.mrb[0].mxu1 }
  0xf7   :  { %v226_v22 = vadd.f32 %v225_v21, %v155_v19  ;;  %v227_v23 = vpop.f32.mrb[1].mxu1 }
  0xf8   :  { %v295_v24 = vpop.f32.mrb[2].mxu0 }
  0xf9   :  { %v296_v25 = vadd.f32 %v295_v24, %v226_v22  ;;  %v297_v26 = vpop.f32.mrb[3].mxu0 }
  0xfa   :  { %v365_v28 = vpop.f32.mrb[2].mxu1 }
  0xfb   :  { %v366_v29 = vadd.f32 %v365_v28, %v296_v25  ;;  %v367_v30 = vpop.f32.mrb[3].mxu1 }
  0xfd   :  { %v369_v31 = vadd.f32 %v366_v29, %v44_v27 }
  0xff   :  { %371 = vst.msk [vmem:[#allocation5] sm:$0x3] %vm36_vm0, %v369_v31 }
 0x100   :  { %428 = shalt.err (!%p425_p12)
}
 0x101   :  { %s429_s22 = scalar_lea.hbm %s484_s1, 32 }
 0x102   :  { %p430_p13 = scmp.ne.s32.totalorder %s484_s1, %s429_s22  ;;  %p433_p0 = scmp.lt.u32.totalorder %s429_s22, %s484_s1 }
 0x104   :  { %p435_p1 = pnand %p433_p0, %p430_p13 }
 0x106   :  { %438 = shalt.err (!%p435_p1)
}
 0x107   :  { %381 = dma.vmem_to_hbm [thread:$0]  %s379_s18, 32, %s484_s1, [#allocation4]  }
 0x108   :  { %441 = dma.done.wait [#allocation4], 32  }
 0x109   :  { %442 = vsyncadd [#allocation4], 4294967264 }
 0x10a   :  { %385 = vsyncpa [#allocation3], 1 }
 0x10b   :  { %386 = vsyncpa [#allocation4], 1 }

</bundles_post_ra>
